<compile_context>
chip_gen: v6e
topology: v6e:2x2x1
jax: 0.10.0
libtpu: 0.0.40
codegen_flags: <defaults>
</compile_context>

<pallas_src>
import functools

import jax
import jax.numpy as jnp
from jax.experimental import pallas as pl
from jax.experimental.pallas import tpu as pltpu

BN_EPS = 1e-9       # DomainSpecificRcBatchNorm2d default eps
RECAL_EPS = 1e-5    # RcBatchNorm2d.recalibration eps

# Keep the (NC_pad, 4) parameter table VMEM-resident only while its padded
# footprint (lanes pad to 128) stays small; otherwise fall back to per-step
# (rows, 4) blocks.
_RESIDENT_PARAM_LIMIT_BYTES = 4 * 1024 * 1024


def _rc_bn_kernel(gate_off_ref, x_ref, p_ref, out_ref, *, rows, hw,
                  params_resident):
    """One tile: rows = (n, c) pairs, cols = flattened H*W.

    gate_off_ref : SMEM (1,) int32, 1 => recalibration gate disabled
    p_ref        : per-row params [scale, shift, cfc0, cfc1] (f32);
                   resident (NC_pad, 4) block or per-step (rows, 4) block.
    """
    if params_resident:
        start = pl.multiple_of(pl.program_id(0) * rows, 8)
        p = p_ref[pl.ds(start, rows), :]                   # (rows, 4)
    else:
        p = p_ref[...]                                     # (rows, 4)

    scale = p[:, 0:1]                                      # (rows, 1) f32
    shift = p[:, 1:2]
    c0 = p[:, 2:3]
    c1 = p[:, 3:4]

    x = x_ref[...]                                         # (rows, HW) native

    @pl.when(gate_off_ref[0] != 0)
    def _():
        # eval & epochs == 0: recalibration disabled -> plain folded BN.
        out_ref[...] = (x * scale.astype(x.dtype)
                        + shift.astype(x.dtype)).astype(out_ref.dtype)

    @pl.when(gate_off_ref[0] == 0)
    def _():
        # --- recalibration gate on the raw input (one-pass statistics) ---
        s = jnp.sum(x, axis=-1, keepdims=True, dtype=jnp.float32)
        sq = jnp.sum(jnp.square(x), axis=-1, keepdims=True, dtype=jnp.float32)
        mean = s * (1.0 / hw)
        # torch.var default is unbiased (divide by HW - 1); HW == 1 gives
        # nan/inf, matching the PyTorch module.  Clamp against catastrophic
        # cancellation of the one-pass formula.
        var = jnp.maximum((sq - s * mean) / (hw - 1), 0.0)
        std = jnp.sqrt(var + RECAL_EPS)
        g = jax.nn.sigmoid(mean * c0 + std * c1)           # (rows, 1) f32

        # Fold the gate into the affine: single fused output pass.
        scale2 = (scale * g).astype(x.dtype)
        shift2 = (shift * g).astype(x.dtype)
        out_ref[...] = (x * scale2 + shift2).astype(out_ref.dtype)


def _pick_row_tile(nc, hw, itemsize, vmem_budget_bytes=28 * 1024 * 1024):
    """Largest row tile fitting a conservative, generation-agnostic budget.

    Budget covers double-buffered native-dtype input + output tiles plus ~2
    f32-tile temporaries, minus an estimate for the resident param block.
    Capped at 1024 rows, rounded to a dtype-aware sublane multiple, and kept
    small enough that a splittable NC always yields >= 2 grid steps so v7x's
    two TensorCores both get work (costs nothing on single-TC v5e/v6e).
    """
    mult = max(8, (8 * 4) // itemsize)        # f32 -> 8, bf16 -> 16, int8 -> 32
    bytes_per_row = hw * (4 * itemsize + 2 * 4)
    resident_est = ((nc + 7) // 8 * 8) * 128 * 4 * 2
    avail = max(vmem_budget_bytes - resident_est, 4 * 1024 * 1024)
    rows = avail // max(bytes_per_row, 1)
    rows = int(min(rows, 1024))
    half = (nc // 2) // mult * mult           # biggest tile still giving 2 steps
    if half >= mult:
        rows = min(rows, half)
    rows = max(mult, (rows // mult) * mult)
    if rows >= nc:
        return nc                             # single block = full row extent
    return rows


def domain_specific_rc_batchnorm2d(x, domain_label, params):
    """x: (N, C, H, W); domain_label: int32 vector.

    params: dict of stacked per-domain tensors
        weight, bias, running_mean, running_var : (D, C)
        cfc                                     : (D, C, 2)
    Returns (out, domain_label) like the PyTorch module.
    """
    N, C, H, W = x.shape
    HW = H * W
    NC = N * C

    dom = domain_label[0]
    w = jnp.take(params["weight"], dom, axis=0).astype(jnp.float32)      # (C,)
    b = jnp.take(params["bias"], dom, axis=0).astype(jnp.float32)
    rm = jnp.take(params["running_mean"], dom, axis=0).astype(jnp.float32)
    rv = jnp.take(params["running_var"], dom, axis=0).astype(jnp.float32)
    cfc = jnp.take(params["cfc"], dom, axis=0).astype(jnp.float32)       # (C, 2)

    # Fold BN into a single scale/shift per channel.
    scale = w * jax.lax.rsqrt(rv + BN_EPS)
    shift = b - rm * scale
    p = jnp.stack([scale, shift, cfc[:, 0], cfc[:, 1]], axis=-1)         # (C, 4)
    p = jnp.broadcast_to(p[None], (N, C, 4)).reshape(NC, 4)              # (NC, 4)

    # epochs semantics: epochs = domain_label[-1] only when the leading dims
    # mismatch; in eval mode epochs == 0 disables the recalibration gate.
    if domain_label.shape[0] != N:
        gate_off = (domain_label[-1] == 0).astype(jnp.int32).reshape(1)
    else:
        gate_off = jnp.zeros((1,), jnp.int32)

    x2d = x.reshape(NC, HW)                   # native dtype, no upcast

    rows = _pick_row_tile(NC, HW, x.dtype.itemsize)
    num_blocks = pl.cdiv(NC, rows)
    grid = (num_blocks,)

    # Pad the param table so any dynamic/tail row slice is in-bounds; padded
    # rows produce outputs that Pallas discards in the masked writeback.
    NC_pad = num_blocks * rows
    if NC_pad != NC:
        p = jnp.pad(p, ((0, NC_pad - NC), (0, 0)))

    params_resident = NC_pad * 128 * 4 <= _RESIDENT_PARAM_LIMIT_BYTES

    row_spec = pl.BlockSpec((rows, HW), lambda i, g: (i, 0))
    if params_resident:
        par_spec = pl.BlockSpec((NC_pad, 4), lambda i, g: (0, 0))  # resident
    else:
        par_spec = pl.BlockSpec((rows, 4), lambda i, g: (i, 0))

    out2d = pl.pallas_call(
        functools.partial(_rc_bn_kernel, rows=rows, hw=HW,
                          params_resident=params_resident),
        out_shape=jax.ShapeDtypeStruct((NC, HW), x.dtype),
        grid_spec=pltpu.PrefetchScalarGridSpec(
            num_scalar_prefetch=1,
            grid=grid,
            in_specs=[row_spec, par_spec],
            out_specs=row_spec),
        compiler_params=pltpu.CompilerParams(
            dimension_semantics=("parallel",),
            vmem_limit_bytes=48 << 20),        # safe on v7x (64 MiB physical)
    )(gate_off, x2d, p)

    return out2d.reshape(N, C, H, W), domain_label


def _reference(x, domain_label, params):
    """Pure-JAX reference of the same eval-mode forward."""
    N, C, H, W = x.shape
    dom = domain_label[0]
    w = params["weight"][dom][None, :, None, None]
    b = params["bias"][dom][None, :, None, None]
    rm = params["running_mean"][dom][None, :, None, None]
    rv = params["running_var"][dom][None, :, None, None]
    cfc = params["cfc"][dom]                               # (C, 2)

    out_bn = (x - rm) / jnp.sqrt(rv + BN_EPS) * w + b
    xf = x.reshape(N, C, -1)
    mean = xf.mean(axis=2)
    var = xf.var(axis=2, ddof=1) + RECAL_EPS
    std = jnp.sqrt(var)
    z = mean * cfc[None, :, 0] + std * cfc[None, :, 1]
    g = jax.nn.sigmoid(z)[:, :, None, None]
    out = out_bn * g
    if domain_label.shape[0] != N:
        out = jnp.where(domain_label[-1] == 0, out_bn, out)
    return out


if __name__ == "__main__":
    N, C, H, W = 2, 4, 16, 16
    D = 4  # num_domains

    key = jax.random.PRNGKey(0)
    kx, kw, kb, krm, krv, kcfc = jax.random.split(key, 6)

    x = jax.random.normal(kx, (N, C, H, W), dtype=jnp.float32)
    domain_label = jnp.array([1, 1], dtype=jnp.int32)

    # Deterministic synthetic parameters (module __init__ would give
    # weight=1, bias=0, running_mean=0, running_var=1, cfc=0; perturbed so
    # the kernel exercises every term).
    params = {
        "weight": 1.0 + 0.1 * jax.random.normal(kw, (D, C), jnp.float32),
        "bias": 0.1 * jax.random.normal(kb, (D, C), jnp.float32),
        "running_mean": 0.1 * jax.random.normal(krm, (D, C), jnp.float32),
        "running_var": 1.0 + 0.1 * jax.random.uniform(krv, (D, C), jnp.float32),
        "cfc": 0.1 * jax.random.normal(kcfc, (D, C, 2), jnp.float32),
    }

    # --- path 1: gate enabled (domain_label length == N) ---
    out, dl = domain_specific_rc_batchnorm2d(x, domain_label, params)
    out = jax.block_until_ready(out)
    ref = _reference(x, domain_label, params)
    assert out.shape == (N, C, H, W)
    assert jnp.allclose(out, ref, atol=1e-5, rtol=1e-5), (
        float(jnp.max(jnp.abs(out - ref))))

    # --- path 2: epochs == 0 -> recalibration gate disabled in-kernel ---
    domain_label2 = jnp.array([1, 1, 0], dtype=jnp.int32)   # len != N, last==0
    out2, _ = domain_specific_rc_batchnorm2d(x, domain_label2, params)
    out2 = jax.block_until_ready(out2)
    ref2 = _reference(x, domain_label2, params)
    assert jnp.allclose(out2, ref2, atol=1e-5, rtol=1e-5), (
        float(jnp.max(jnp.abs(out2 - ref2))))

    print("KERNEL_OK")
</pallas_src>

<mosaic_0001>
module attributes {stable_mosaic.version = 11 : i64} {
  func.func @_rc_bn_kernel(%arg0: i32, %arg1: memref<1xi32, #tpu.memory_space<smem>>, %arg2: memref<8x256xf32, #tpu.memory_space<vmem>>, %arg3: memref<8x4xf32, #tpu.memory_space<vmem>>, %arg4: memref<8x256xf32, #tpu.memory_space<vmem>>) attributes {dimension_semantics = [#tpu.dimension_semantics<parallel>], iteration_bounds = array<i64: 1>, scalar_prefetch = 1 : i64, scratch_operands = 0 : i64, tpu.core_type = #tpu.core_type<tc>, window_params = [{transform_indices = @transform_0, window_bounds = array<i64: 8, 256>}, {pipeline_mode = #tpu.pipeline_mode<synchronous>, transform_indices = @transform_1, window_bounds = array<i64: 8, 4>}, {transform_indices = @transform_2, window_bounds = array<i64: 8, 256>}]} {
    %c8_i32 = arith.constant 8 : i32
    %0 = arith.muli %arg0, %c8_i32 : i32
    %1 = tpu.assume_multiple %0, 8 : i32
    %2 = arith.index_cast %1 : i32 to index
    %c0 = arith.constant 0 : index
    %3 = vector.load %arg3[%2, %c0] : memref<8x4xf32, #tpu.memory_space<vmem>>, vector<8x4xf32>
    %4 = vector.extract_strided_slice %3 {offsets = [0, 0], sizes = [8, 1], strides = [1, 1]} : vector<8x4xf32> to vector<8x1xf32>
    %5 = vector.extract_strided_slice %3 {offsets = [0, 1], sizes = [8, 1], strides = [1, 1]} : vector<8x4xf32> to vector<8x1xf32>
    %6 = vector.extract_strided_slice %3 {offsets = [0, 2], sizes = [8, 1], strides = [1, 1]} : vector<8x4xf32> to vector<8x1xf32>
    %7 = vector.extract_strided_slice %3 {offsets = [0, 3], sizes = [8, 1], strides = [1, 1]} : vector<8x4xf32> to vector<8x1xf32>
    %c0_0 = arith.constant 0 : index
    %c0_1 = arith.constant 0 : index
    %8 = vector.load %arg2[%c0_0, %c0_1] : memref<8x256xf32, #tpu.memory_space<vmem>>, vector<8x256xf32>
    %c0_2 = arith.constant 0 : index
    %9 = memref.load %arg1[%c0_2] : memref<1xi32, #tpu.memory_space<smem>>
    %c0_i32 = arith.constant 0 : i32
    %10 = arith.cmpi ne, %9, %c0_i32 : i32
    %11 = arith.extui %10 : i1 to i32
    %c0_i32_3 = arith.constant 0 : i32
    %12 = arith.cmpi ne, %11, %c0_i32_3 : i32
    scf.if %12 {
      %17 = vector.broadcast %4 : vector<8x1xf32> to vector<8x256xf32>
      %18 = arith.mulf %8, %17 : vector<8x256xf32>
      %19 = vector.broadcast %5 : vector<8x1xf32> to vector<8x256xf32>
      %20 = arith.addf %18, %19 : vector<8x256xf32>
      %c0_7 = arith.constant 0 : index
      %c0_8 = arith.constant 0 : index
      %21 = vector.load %arg4[%c0_7, %c0_8] : memref<8x256xf32, #tpu.memory_space<vmem>>, vector<8x256xf32>
      tpu.vector_store %arg4[%c0_7, %c0_8], %20 {strides = array<i32>} : memref<8x256xf32, #tpu.memory_space<vmem>>, vector<8x256xf32>,
    } else {
    }
    %c0_4 = arith.constant 0 : index
    %13 = memref.load %arg1[%c0_4] : memref<1xi32, #tpu.memory_space<smem>>
    %c0_i32_5 = arith.constant 0 : i32
    %14 = arith.cmpi eq, %13, %c0_i32_5 : i32
    %15 = arith.extui %14 : i1 to i32
    %c0_i32_6 = arith.constant 0 : i32
    %16 = arith.cmpi ne, %15, %c0_i32_6 : i32
    scf.if %16 {
      %cst = arith.constant dense<0.000000e+00> : vector<8xf32>
      %17 = vector.multi_reduction <add>, %8, %cst [1] : vector<8x256xf32> to vector<8xf32>
      %18 = vector.shape_cast %17 : vector<8xf32> to vector<8x1xf32>
      %19 = arith.mulf %8, %8 : vector<8x256xf32>
      %cst_7 = arith.constant dense<0.000000e+00> : vector<8xf32>
      %20 = vector.multi_reduction <add>, %19, %cst_7 [1] : vector<8x256xf32> to vector<8xf32>
      %21 = vector.shape_cast %20 : vector<8xf32> to vector<8x1xf32>
      %cst_8 = arith.constant 3.906250e-03 : f32
      %22 = vector.broadcast %cst_8 : f32 to vector<8x1xf32>
      %23 = arith.mulf %18, %22 : vector<8x1xf32>
      %24 = arith.mulf %18, %23 : vector<8x1xf32>
      %25 = arith.subf %21, %24 : vector<8x1xf32>
      %cst_9 = arith.constant 2.550000e+02 : f32
      %26 = vector.broadcast %cst_9 : f32 to vector<8x1xf32>
      %27 = arith.divf %25, %26 : vector<8x1xf32>
      %cst_10 = arith.constant 0.000000e+00 : f32
      %28 = vector.broadcast %cst_10 : f32 to vector<8x1xf32>
      %29 = arith.maximumf %27, %28 : vector<8x1xf32>
      %cst_11 = arith.constant 9.99999974E-6 : f32
      %30 = vector.broadcast %cst_11 : f32 to vector<8x1xf32>
      %31 = arith.addf %29, %30 : vector<8x1xf32>
      %32 = math.sqrt %31 : vector<8x1xf32>
      %33 = arith.mulf %23, %6 : vector<8x1xf32>
      %34 = arith.mulf %32, %7 : vector<8x1xf32>
      %35 = arith.addf %33, %34 : vector<8x1xf32>
      %36 = arith.negf %35 : vector<8x1xf32>
      %37 = math.exp %36 : vector<8x1xf32>
      %cst_12 = arith.constant 1.000000e+00 : f32
      %38 = vector.broadcast %cst_12 : f32 to vector<8x1xf32>
      %39 = arith.addf %38, %37 : vector<8x1xf32>
      %40 = arith.divf %38, %39 : vector<8x1xf32>
      %41 = arith.mulf %4, %40 : vector<8x1xf32>
      %42 = arith.mulf %5, %40 : vector<8x1xf32>
      %43 = vector.broadcast %41 : vector<8x1xf32> to vector<8x256xf32>
      %44 = arith.mulf %8, %43 : vector<8x256xf32>
      %45 = vector.broadcast %42 : vector<8x1xf32> to vector<8x256xf32>
      %46 = arith.addf %44, %45 : vector<8x256xf32>
      %c0_13 = arith.constant 0 : index
      %c0_14 = arith.constant 0 : index
      %47 = vector.load %arg4[%c0_13, %c0_14] : memref<8x256xf32, #tpu.memory_space<vmem>>, vector<8x256xf32>
      tpu.vector_store %arg4[%c0_13, %c0_14], %46 {strides = array<i32>} : memref<8x256xf32, #tpu.memory_space<vmem>>, vector<8x256xf32>,
    } else {
    }
    return
  }
  func.func @transform_0(%arg0: i32, %arg1: memref<1xi32, #tpu.memory_space<smem>>) -> (i32, i32) {
    %c0_i32 = arith.constant 0 : i32
    %c0_i32_0 = arith.constant 0 : i32
    return %arg0, %c0_i32 : i32, i32
  }
  func.func @transform_1(%arg0: i32, %arg1: memref<1xi32, #tpu.memory_space<smem>>) -> (i32, i32) {
    %c0_i32 = arith.constant 0 : i32
    %c0_i32_0 = arith.constant 0 : i32
    %c0_i32_1 = arith.constant 0 : i32
    return %c0_i32, %c0_i32_0 : i32, i32
  }
  func.func @transform_2(%arg0: i32, %arg1: memref<1xi32, #tpu.memory_space<smem>>) -> (i32, i32) {
    %c0_i32 = arith.constant 0 : i32
    %c0_i32_0 = arith.constant 0 : i32
    return %arg0, %c0_i32 : i32, i32
  }
}

</mosaic_0001>

<bundles_post_ra>
// kernel: tpu_custom_call.1
= control target key start
LH: loop header
LB: loop body
LE: loop exit
PB: predicated region body
PF: predicated region fallthrough
CT: control target
= control target key end

     0   :  { %s259_s0 = inlined_call_operand.<no memory space> [shape: s32[1], index: 0, kind: input, shape index: {}]   ;;  %s260_s1 = inlined_call_operand.hbm [shape: f32[8,256], index: 1, kind: input, shape index: {}]   ;;  %s261_s2 = inlined_call_operand.vmem [shape: f32[8,4], index: 2, kind: input, shape index: {}]   ;;  %s262_s3 = inlined_call_operand.hbm [shape: f32[8,256], index: 3, kind: output, shape index: {}]  }
   0x1   :  { %8 = sst [smem:[#allocation3]] %s259_s0 }
   0x2   :  { %9 = vsyncpa [#allocation5], 0 }
   0x3   :  { %10 = vsyncpa [#allocation6], 0  ;;  %s197_s14 = smov [#allocation4]  }
   0x4   :  { %s17_s15 = sshll.u32 %s197_s14, 4  ;;  %s18_s15 = int_to_ptr.vmem [resolvable:$true] %s17_s15 }
   0x5   :  { %s161_s16 = scalar_lea.vmem %s18_s15, 256  ;;  %p166_p1 = scmp.lt.s32.totalorder %s18_s15, %s18_s15 }
   0x6   :  { %p162_p0 = scmp.ne.s32.totalorder %s18_s15, %s161_s16  ;;  %p167_p2 = scmp.lt.s32.totalorder %s161_s16, %s161_s16 }
   0x8   :  { %p168_p3 = por %p167_p2, %p166_p1 }
   0xa   :  { %p169_p4 = pnand %p168_p3, %p162_p0 }
   0xc   :  { %172 = shalt.err (!%p169_p4)
}
   0xd   :  { %20 = dma.hbm_to_vmem [thread:$0]  %s260_s1, 256, %s18_s15, [#allocation5]  }
   0xe   :  { %193 = dma.done.wait [#allocation5], 256  }
   0xf   :  { %194 = vsyncadd [#allocation5], 4294967040  ;;  %s31_s19 = sld [smem:[#allocation3]]  ;;  %v234_v0 = vld [vmem:[%s261_s2] sm:$0xff]  ;;  %v238_v2 = vld [vmem:[#allocation4 + $0x8] sm:$0xff] }
  0x10   :  { %v236_v1 = vld [vmem:[#allocation4] sm:$0xff] }
  0x15   :  { %p131_p5 = scmp.eq.s32.totalorder %s31_s19, 0 }
  0x17   :  { %35 = sbr.rel (%p131_p5) target bundleno = 162 (0xa2), region = 17 }
  0x1c   :  { %v198_v3 = vmov 0   ;;  %v199_v4 = vmov 1  }
  0x1d   :  { %142 = vset.pattern.permute.xlu0 %v198_v3 }
  0x1e   :  { %38 = vperm.xlu0 %142, %v234_v0  }
  0x22   :  { %143 = vset.pattern.permute.xlu0 %v199_v4 }
  0x23   :  { %44 = vperm.xlu0 %143, %v234_v0  }
  0x99   :  { %v39_v5 = vpop.permute.xlu0 %38 }
  0x9a   :  { %v41_v6 = vmul.f32 %v39_v5, %v236_v1  ;;  %v42_v7 = vmul.f32 %v39_v5, %v238_v2 }
  0x9e   :  { %v45_v8 = vpop.permute.xlu0 %44 }
  0x9f   :  { %v47_v9 = vadd.f32 %v45_v8, %v41_v6  ;;  %v48_v10 = vadd.f32 %v45_v8, %v42_v7 }
  0xa1   :  { %49 = vst [vmem:[#allocation7] sm:$0xff] %v47_v9  ;;  %50 = vst [vmem:[#allocation7 + $0x8] sm:$0xff] %v48_v10 }
  0xa2 PF:  { %s51_s1 = sld [smem:[#allocation3]] }
  0xa8   :  { %p132_p6 = scmp.ne.s32.totalorder %s51_s1, 0 }
  0xa9   :  { %s200_s2 = smov (!%p132_p6), 127   ;;  %s203_s21 = smov (!%p132_p6), 126  }
  0xaa   :  { %55 = sbr.rel (%p132_p6) target bundleno = 745 (0x2e9), region = 21 }
  0xaf   :  { %v56_v11 = vadd.f32 %v238_v2, %v236_v1  ;;  %v59_v12 = vmul.f32 %v236_v1, %v236_v1  ;;  %v60_v13 = vmul.f32 %v238_v2, %v238_v2  ;;  %v201_v35 = vmov 0  }
  0xb0   :  { %144 = vset.pattern.permute.xlu1 %v201_v35  ;;  %v202_v36 = vmov 1  }
  0xb1   :  { %57 = vadd.xlane.f32.xlu0 %v56_v11  ;;  %v61_v14 = vadd.f32 %v60_v13, %v59_v12 }
  0xb2   :  { %146 = vset.pattern.permute.xlu0 %v202_v36 }
  0xb5   :  { %62 = vadd.xlane.f32.xlu0 %v61_v14 }
 0x13a   :  { %v58_v15 = vpop.xlane.xlu0 %57 }
 0x13b   :  { %v64_v16 = vmul.f32 0.00390625, %v58_v15 }
 0x13d   :  { %v65_v17 = vmul.f32 %v64_v16, %v58_v15  ;;  %v78_v29 = vmul.f32 %v64_v16, %v234_v0 }
 0x13e   :  { %v63_v18 = vpop.xlane.xlu0 %62 }
 0x13f   :  { %v66_v19 = vsub.f32 %v63_v18, %v65_v17 }
 0x141   :  { %v68_v20 = vmul.f32 0.003921569, %v66_v19 }
 0x143   :  { %v69_v21 = vmax.f32 %v68_v20, 0.0 }
 0x145   :  { %v70_v22 = vadd.f32 1e-05, %v69_v21 }
 0x147   :  { %147 = vrsqrt.f32 %v70_v22  ;;  %vm73_vm0 = vcmp.eq.f32.partialorder %v70_v22, inf  ;;  %v76_v25 = vand.u32 2147483648, %v70_v22  ;;  %vm75_vm1 = vcmp.eq.f32.partialorder %v70_v22, 0.0 }
 0x154   :  { %v148_v23 = vpop.eup %147 }
 0x155   :  { %v72_v24 = vmul.f32 %v148_v23, %v70_v22 }
 0x157   :  { %v74_v26 = vsel %vm73_vm0, %v70_v22, %v72_v24 }
 0x158   :  { %v77_v27 = vsel %vm75_vm1, %v76_v25, %v74_v26 }
 0x159   :  { %v79_v28 = vmul.f32 %v77_v27, %v234_v0 }
 0x15b   :  { %81 = vrot.lane.b32.xlu1 %v79_v28, %s200_s2 }
 0x1cd   :  { %v82_v30 = vpop.permute.xlu1 %81 }
 0x1ce   :  { %v84_v31 = vadd.f32 %v82_v30, %v78_v29 }
 0x1d0   :  { %v133_v32 = vmul.f32 -1.442695, %v84_v31 }
 0x1d2   :  { %149 = vpow2.f32 %v133_v32 }
 0x1df   :  { %v150_v33 = vpop.eup %149 }
 0x1e0   :  { %v88_v34 = vadd.f32 1.0, %v150_v33 }
 0x1e2   :  { %151 = vrcp.f32 %v88_v34 }
 0x1ef   :  { %v152_v37 = vpop.eup %151 }
 0x1f0   :  { %96 = vrot.lane.b32.xlu0 %v152_v37, %s200_s2  ;;  %92 = vrot.lane.b32.xlu1 %v152_v37, %s203_s21 }
 0x262   :  { %v93_v38 = vpop.permute.xlu1 %92  ;;  %v97_v40 = vpop.permute.xlu0 %96 }
 0x263   :  { %v95_v39 = vmul.f32 %v93_v38, %v234_v0  ;;  %v99_v41 = vmul.f32 %v97_v40, %v234_v0 }
 0x265   :  { %102 = vperm.xlu1 %144, %v95_v39  }
 0x269   :  { %145 = vset.pattern.permute.xlu1 %v202_v36 }
 0x26a   :  { %109 = vperm.xlu1 %145, %v99_v41  }
 0x2e0   :  { %v103_v42 = vpop.permute.xlu1 %102 }
 0x2e1   :  { %v105_v43 = vmul.f32 %v103_v42, %v236_v1  ;;  %v106_v44 = vmul.f32 %v103_v42, %v238_v2 }
 0x2e5   :  { %v110_v45 = vpop.permute.xlu1 %109 }
 0x2e6   :  { %v112_v46 = vadd.f32 %v110_v45, %v105_v43  ;;  %v113_v47 = vadd.f32 %v110_v45, %v106_v44 }
 0x2e8   :  { %114 = vst [vmem:[#allocation7] sm:$0xff] %v112_v46  ;;  %115 = vst [vmem:[#allocation7 + $0x8] sm:$0xff] %v113_v47 }
 0x2e9 PF:  { %s204_s22 = smov [#allocation7]  }
 0x2ea   :  { %s122_s23 = sshll.u32 %s204_s22, 4  ;;  %s123_s23 = int_to_ptr.vmem [resolvable:$true] %s122_s23 }
 0x2eb   :  { %s173_s24 = scalar_lea.vmem %s123_s23, 256  ;;  %p178_p8 = scmp.lt.s32.totalorder %s123_s23, %s123_s23 }
 0x2ec   :  { %p174_p7 = scmp.ne.s32.totalorder %s123_s23, %s173_s24  ;;  %p179_p9 = scmp.lt.s32.totalorder %s173_s24, %s173_s24 }
 0x2ee   :  { %p180_p10 = por %p179_p9, %p178_p8 }
 0x2f0   :  { %p181_p11 = pnand %p180_p10, %p174_p7 }
 0x2f2   :  { %184 = shalt.err (!%p181_p11)
}
 0x2f3   :  { %125 = dma.vmem_to_hbm [thread:$0]  %s123_s23, 256, %s262_s3, [#allocation6]  }
 0x2f4   :  { %195 = dma.done.wait [#allocation6], 256  }
 0x2f5   :  { %196 = vsyncadd [#allocation6], 4294967040 }
 0x2f6   :  { %129 = vsyncpa [#allocation5], 1 }
 0x2f7   :  { %130 = vsyncpa [#allocation6], 1 }

</bundles_post_ra>
